<compile_context>
chip_gen: v5e
topology: v5e:2x2
jax: 0.10.0
libtpu: 0.0.40
codegen_flags: <defaults>
</compile_context>

<pallas_src>
import jax
import jax.numpy as jnp
from jax.experimental import pallas as pl
from jax.experimental.pallas import tpu as pltpu


def hamiltonian_dynamics_kernel(z_ref, m_ref, b_ref, out_ref):
    """out = z @ M' + b'.

    The symplectic permutation/negation is already folded into M'/b' by the
    wrapper, so the kernel is one MXU matmul (bf16 in, f32 accumulate) and an
    f32 bias add — zero cross-lane shuffles.
    """
    acc = jnp.dot(z_ref[...], m_ref[...], preferred_element_type=jnp.float32)
    out_ref[...] = (acc + b_ref[...].astype(jnp.float32)).astype(out_ref.dtype)


def _pick_batch_tile(B):
    """Largest row tile <= 512 that divides B and is a sublane multiple."""
    for tm in (512, 256, 128, 64, 32, 16, 8):
        if B % tm == 0:
            return tm
    return B  # full-extent block (allowed even if not a multiple of 8)


def hamiltonian_dynamics(t, z, M, b, *, matmul_dtype=jnp.bfloat16):
    """Pallas wrapper mirroring HamiltonianDynamics.forward(t, z).

    t is accepted for API parity; the chosen Hamiltonian is time-independent.
    Returns sg = J * dH/dz with dH/dz = z @ M + b (M must be symmetric for
    this to equal grad of 0.5 z M z^T + z b).
    """
    del t  # time-independent H
    B, D = z.shape
    assert D % 2 == 0, "phase-space dim D must be even ([q ; p] split)"
    half = D // 2

    # Fold the symplectic structure into the weights (done once, on host/XLA):
    #   sg[:, :half] =  rg[:, half:]  and  sg[:, half:] = -rg[:, :half]
    # with rg = z @ M + b  =>  sg = z @ M' + b'.
    M_sym = jnp.concatenate([M[:, half:], -M[:, :half]], axis=1)
    b_sym = jnp.concatenate([b[:, half:], -b[:, :half]], axis=1).astype(jnp.float32)

    # bf16 MXU inputs, f32 accumulation/bias/epilogue.
    z_in = z.astype(matmul_dtype)
    M_in = M_sym.astype(matmul_dtype)

    TM = _pick_batch_tile(B)
    grid = (B // TM,)

    # VMEM sizing: double-buffered z/out tiles + resident M'/b', plus headroom.
    isz_in = jnp.dtype(matmul_dtype).itemsize
    isz_out = jnp.dtype(z.dtype).itemsize
    resident = 2 * (TM * D * isz_in + TM * D * isz_out) + 2 * (D * D * isz_in) \
        + 2 * (D * 4)
    vmem_limit = min(max(resident + (4 << 20), 16 << 20), 64 << 20)

    return pl.pallas_call(
        hamiltonian_dynamics_kernel,
        out_shape=jax.ShapeDtypeStruct((B, D), z.dtype),
        grid_spec=pltpu.PrefetchScalarGridSpec(
            num_scalar_prefetch=0,
            grid=grid,
            in_specs=[
                pl.BlockSpec((TM, D), lambda i: (i, 0)),   # z tile: streams
                pl.BlockSpec((D, D), lambda i: (0, 0)),    # M': VMEM-resident
                pl.BlockSpec((1, D), lambda i: (0, 0)),    # b': VMEM-resident
            ],
            out_specs=pl.BlockSpec((TM, D), lambda i: (i, 0)),
        ),
        compiler_params=pltpu.CompilerParams(
            dimension_semantics=("parallel",),
            vmem_limit_bytes=vmem_limit,
        ),
    )(z_in, M_in, b_sym)


if __name__ == "__main__":
    # TODO(synk): nfe counter and wgrad (create_graph higher-order autograd)
    # are PyTorch-module state / autograd features with no in-kernel
    # equivalent.
    B, D = 256, 128  # D = 128: lane-dense output (full vreg lane width)

    key = jax.random.PRNGKey(0)
    kz, km, kb = jax.random.split(key, 3)

    z = jax.random.normal(kz, (B, D), dtype=jnp.float32)
    A = jax.random.normal(km, (D, D), dtype=jnp.float32) * 0.1
    M = 0.5 * (A + A.T)  # symmetric -> grad of 0.5 z M z^T is z @ M
    assert jnp.allclose(M, M.T), "M must be symmetric for the analytic gradient"
    b = jax.random.normal(kb, (1, D), dtype=jnp.float32) * 0.1
    t = jnp.float32(0.0)

    sg = jax.block_until_ready(hamiltonian_dynamics(t, z, M, b))

    # Reference mirroring the PyTorch semantics exactly:
    # h = H(t, z).sum(); rg = grad(h, z); sg = [rg[:, D/2:], -rg[:, :D/2]].
    def H_fn(zz):
        quad = 0.5 * jnp.einsum("bi,ij,bj->b", zz, M, zz)
        lin = jnp.sum(zz * b, axis=-1)
        return quad + lin

    rg_ref = jax.grad(lambda zz: jnp.sum(H_fn(zz)))(z)
    half = D // 2
    sg_ref = jnp.concatenate([rg_ref[:, half:], -rg_ref[:, :half]], axis=-1)

    assert sg.shape == (B, D) and sg.dtype == z.dtype
    # bf16 MXU inputs with f32 accumulation -> slightly looser tolerance.
    assert jnp.allclose(sg, sg_ref, atol=5e-2, rtol=5e-2), (
        "mismatch vs autograd reference")
    print("KERNEL_OK")
</pallas_src>

<mosaic_0001>
module attributes {stable_mosaic.version = 11 : i64} {
  func.func @hamiltonian_dynamics_kernel(%arg0: i32, %arg1: memref<256x128xbf16, #tpu.memory_space<vmem>>, %arg2: memref<128x128xbf16, #tpu.memory_space<vmem>>, %arg3: memref<1x128xf32, #tpu.memory_space<vmem>>, %arg4: memref<256x128xf32, #tpu.memory_space<vmem>>) attributes {dimension_semantics = [#tpu.dimension_semantics<parallel>], iteration_bounds = array<i64: 1>, scalar_prefetch = 0 : i64, scratch_operands = 0 : i64, tpu.core_type = #tpu.core_type<tc>, window_params = [{transform_indices = @transform_0, window_bounds = array<i64: 256, 128>}, {pipeline_mode = #tpu.pipeline_mode<synchronous>, transform_indices = @transform_1, window_bounds = array<i64: 128, 128>}, {pipeline_mode = #tpu.pipeline_mode<synchronous>, transform_indices = @transform_2, window_bounds = array<i64: 1, 128>}, {transform_indices = @transform_3, window_bounds = array<i64: 256, 128>}]} {
    %c0 = arith.constant 0 : index
    %c0_0 = arith.constant 0 : index
    %0 = vector.load %arg1[%c0, %c0_0] : memref<256x128xbf16, #tpu.memory_space<vmem>>, vector<256x128xbf16>
    %c0_1 = arith.constant 0 : index
    %c0_2 = arith.constant 0 : index
    %1 = vector.load %arg2[%c0_1, %c0_2] : memref<128x128xbf16, #tpu.memory_space<vmem>>, vector<128x128xbf16>
    %cst = arith.constant dense<0.000000e+00> : vector<256x128xf32>
    %2 = tpu.matmul %0, %1, %cst {dimension_numbers = #tpu.dot_dimension_numbers<[1], [0], [0], [1], [0, 0, 1, 1], [], []>} : vector<256x128xbf16>, vector<128x128xbf16>, vector<256x128xf32> -> vector<256x128xf32>
    %c0_3 = arith.constant 0 : index
    %c0_4 = arith.constant 0 : index
    %3 = vector.load %arg3[%c0_3, %c0_4] : memref<1x128xf32, #tpu.memory_space<vmem>>, vector<1x128xf32>
    %4 = vector.broadcast %3 : vector<1x128xf32> to vector<256x128xf32>
    %5 = arith.addf %2, %4 : vector<256x128xf32>
    %c0_5 = arith.constant 0 : index
    %c0_6 = arith.constant 0 : index
    %6 = vector.load %arg4[%c0_5, %c0_6] : memref<256x128xf32, #tpu.memory_space<vmem>>, vector<256x128xf32>
    tpu.vector_store %arg4[%c0_5, %c0_6], %5 {strides = array<i32>} : memref<256x128xf32, #tpu.memory_space<vmem>>, vector<256x128xf32>,
    return
  }
  func.func @transform_0(%arg0: i32) -> (i32, i32) {
    %c0_i32 = arith.constant 0 : i32
    %c0_i32_0 = arith.constant 0 : i32
    return %arg0, %c0_i32 : i32, i32
  }
  func.func @transform_1(%arg0: i32) -> (i32, i32) {
    %c0_i32 = arith.constant 0 : i32
    %c0_i32_0 = arith.constant 0 : i32
    %c0_i32_1 = arith.constant 0 : i32
    return %c0_i32, %c0_i32_0 : i32, i32
  }
  func.func @transform_2(%arg0: i32) -> (i32, i32) {
    %c0_i32 = arith.constant 0 : i32
    %c0_i32_0 = arith.constant 0 : i32
    %c0_i32_1 = arith.constant 0 : i32
    return %c0_i32, %c0_i32_0 : i32, i32
  }
  func.func @transform_3(%arg0: i32) -> (i32, i32) {
    %c0_i32 = arith.constant 0 : i32
    %c0_i32_0 = arith.constant 0 : i32
    return %arg0, %c0_i32 : i32, i32
  }
}

</mosaic_0001>

<bundles_post_ra>
// kernel: tpu_custom_call.1
= control target key start
LH: loop header
LB: loop body
LE: loop exit
PB: predicated region body
PF: predicated region fallthrough
CT: control target
= control target key end

     0   :  { %8 = vsyncpa [#allocation3], 0  ;;  %s687_s0 = inlined_call_operand.hbm [shape: bf16[256,128], index: 0, kind: input, shape index: {}]   ;;  %s688_s1 = inlined_call_operand.hbm [shape: bf16[128,128], index: 1, kind: input, shape index: {}]   ;;  %s689_s2 = inlined_call_operand.vmem [shape: f32[1,128], index: 2, kind: input, shape index: {}]   ;;  %s690_s3 = inlined_call_operand.hbm [shape: f32[256,128], index: 3, kind: output, shape index: {}]  }
   0x1   :  { %9 = vsyncpa [#allocation6], 0 }
   0x2   :  { %10 = vsyncpa [#allocation4], 0  ;;  %s15_s14 = sshll.u32 %s687_s0, 4  ;;  %s614_s15 = smov [#allocation2]   ;;  %s16_s14 = int_to_ptr.hbm [resolvable:$true] %s15_s14 }
   0x3   :  { %s17_s16 = sshll.u32 %s614_s15, 4  ;;  %s28_s19 = sshll.u32 %s688_s1, 4  ;;  %s18_s16 = int_to_ptr.vmem [resolvable:$true] %s17_s16  ;;  %s29_s19 = int_to_ptr.hbm [resolvable:$true] %s28_s19 }
   0x4   :  { %s615_s20 = smov 64   ;;  %s616_s21 = smov 4  }
   0x5   :  { %23 = dma.hbm_to_vmem [thread:$0]  %s16_s14, 2048, %s18_s16, [#allocation3], %s615_s20, %s615_s20, %s616_s21  }
   0x6   :  { %s617_s22 = smov [#allocation5]  }
   0x7   :  { %s30_s23 = sshll.u32 %s617_s22, 4  ;;  %s31_s23 = int_to_ptr.vmem [resolvable:$true] %s30_s23 }
   0x8   :  { %36 = dma.hbm_to_vmem [thread:$0]  %s29_s19, 1024, %s31_s23, [#allocation6], %s615_s20, %s615_s20, %s616_s21  }
   0x9   :  { %608 = dma.done.wait [#allocation3], 2048  }
   0xa   :  { %609 = vsyncadd [#allocation3], 4294965248 }
   0xb   :  { %610 = dma.done.wait [#allocation6], 1024  }
   0xc   :  { %611 = vsyncadd [#allocation6], 4294966272  ;;  %v503_v0 = vld [vmem:[#allocation5 + $0x38] sm:$0xff]  ;;  %v502_v1 = vld [vmem:[#allocation5 + $0x30] sm:$0xff]  ;;  %s370_s27 = sshll.u32 %s690_s3, 4  ;;  %s619_s28 = smov 128   ;;  %s371_s27 = int_to_ptr.hbm [resolvable:$true] %s370_s27 }
   0xd   :  { %243 = vmatpush.bf16.msra.mxu0 %v503_v0  ;;  %504 = vmatpush.bf16.msra.mxu1 %v503_v0  ;;  %v501_v2 = vld [vmem:[#allocation5 + $0x28] sm:$0xff]  ;;  %v500_v3 = vld [vmem:[#allocation5 + $0x20] sm:$0xff]  ;;  %v499_v4 = vld [vmem:[#allocation5 + $0x18] sm:$0xff]  ;;  %s620_s29 = smov 8  }
   0xe   :  { %505 = vmatpush.bf16.msra.mxu2 %v503_v0  ;;  %506 = vmatpush.bf16.msra.mxu3 %v503_v0  ;;  %v498_v5 = vld [vmem:[#allocation5 + $0x10] sm:$0xff]  ;;  %v497_v6 = vld [vmem:[#allocation5 + $0x8] sm:$0xff]  ;;  %v496_v7 = vld [vmem:[#allocation5] sm:$0xff] }
   0xf   :  { %v480_v8 = vld [vmem:[#allocation2] sm:$0xff]  ;;  %v481_v12 = vld [vmem:[#allocation2 + $0x8] sm:$0xff]  ;;  %v482_v16 = vld [vmem:[#allocation2 + $0x10] sm:$0xff] }
  0x10   :  { %v484_v9 = vld [vmem:[#allocation2 + $0x20] sm:$0xff]  ;;  %v485_v13 = vld [vmem:[#allocation2 + $0x28] sm:$0xff]  ;;  %v486_v17 = vld [vmem:[#allocation2 + $0x30] sm:$0xff] }
  0x11   :  { %244 = vmatpush.bf16.msra.mxu0 %v502_v1  ;;  %507 = vmatpush.bf16.msra.mxu1 %v502_v1  ;;  %v488_v10 = vld [vmem:[#allocation2 + $0x40] sm:$0xff]  ;;  %v489_v14 = vld [vmem:[#allocation2 + $0x48] sm:$0xff]  ;;  %v490_v18 = vld [vmem:[#allocation2 + $0x50] sm:$0xff] }
  0x12   :  { %508 = vmatpush.bf16.msra.mxu2 %v502_v1  ;;  %509 = vmatpush.bf16.msra.mxu3 %v502_v1  ;;  %v492_v11 = vld [vmem:[#allocation2 + $0x60] sm:$0xff]  ;;  %v493_v15 = vld [vmem:[#allocation2 + $0x68] sm:$0xff]  ;;  %v494_v19 = vld [vmem:[#allocation2 + $0x70] sm:$0xff] }
  0x13   :  { %v483_v20 = vld [vmem:[#allocation2 + $0x18] sm:$0xff]  ;;  %v650_v24 = vld [vmem:[%s689_s2] ss:$0 sm:$0xff]  ;;  %s618_s2 = smov [#allocation7]  }
  0x14   :  { %v487_v21 = vld [vmem:[#allocation2 + $0x38] sm:$0xff]  ;;  %s368_s24 = sshll.u32 %s618_s2, 4  ;;  %s369_s24 = int_to_ptr.vmem [resolvable:$true] %s368_s24 }
  0x15   :  { %245 = vmatpush.bf16.msra.mxu0 %v501_v2  ;;  %510 = vmatpush.bf16.msra.mxu1 %v501_v2  ;;  %v491_v22 = vld [vmem:[#allocation2 + $0x58] sm:$0xff] }
  0x16   :  { %511 = vmatpush.bf16.msra.mxu2 %v501_v2  ;;  %512 = vmatpush.bf16.msra.mxu3 %v501_v2  ;;  %v495_v23 = vld [vmem:[#allocation2 + $0x78] sm:$0xff] }
  0x19   :  { %246 = vmatpush.bf16.msra.mxu0 %v500_v3  ;;  %513 = vmatpush.bf16.msra.mxu1 %v500_v3 }
  0x1a   :  { %514 = vmatpush.bf16.msra.mxu2 %v500_v3  ;;  %515 = vmatpush.bf16.msra.mxu3 %v500_v3 }
  0x1d   :  { %247 = vmatpush.bf16.msra.mxu0 %v499_v4  ;;  %516 = vmatpush.bf16.msra.mxu1 %v499_v4 }
  0x1e   :  { %517 = vmatpush.bf16.msra.mxu2 %v499_v4  ;;  %518 = vmatpush.bf16.msra.mxu3 %v499_v4 }
  0x21   :  { %248 = vmatpush.bf16.msra.mxu0 %v498_v5  ;;  %519 = vmatpush.bf16.msra.mxu1 %v498_v5 }
  0x22   :  { %520 = vmatpush.bf16.msra.mxu2 %v498_v5  ;;  %521 = vmatpush.bf16.msra.mxu3 %v498_v5 }
  0x25   :  { %249 = vmatpush.bf16.msra.mxu0 %v497_v6  ;;  %522 = vmatpush.bf16.msra.mxu1 %v497_v6 }
  0x26   :  { %523 = vmatpush.bf16.msra.mxu2 %v497_v6  ;;  %524 = vmatpush.bf16.msra.mxu3 %v497_v6 }
  0x29   :  { %250 = vmatpush.bf16.msra.mxu0 %v496_v7  ;;  %525 = vmatpush.bf16.msra.mxu1 %v496_v7 }
  0x2a   :  { %526 = vmatpush.bf16.msra.mxu2 %v496_v7  ;;  %527 = vmatpush.bf16.msra.mxu3 %v496_v7 }
  0x2c   :  { %251 = vmatmul.bf16.vlgmr.msra.gmra.mxu0 %v480_v8  ;;  %271 = vmatmul.bf16.vlgmr.msra.gmra.mxu1 %v484_v9 }
  0x2d   :  { %291 = vmatmul.bf16.vlgmr.msra.gmra.mxu2 %v488_v10  ;;  %311 = vmatmul.bf16.vlgmr.msra.gmra.mxu3 %v492_v11 }
  0x3c   :  { %256 = vmatmul.bf16.gmra.mxu0 %v481_v12  ;;  %276 = vmatmul.bf16.gmra.mxu1 %v485_v13 }
  0x3d   :  { %296 = vmatmul.bf16.gmra.mxu2 %v489_v14  ;;  %316 = vmatmul.bf16.gmra.mxu3 %v493_v15 }
  0x4c   :  { %261 = vmatmul.bf16.gmra.mxu0 %v482_v16  ;;  %281 = vmatmul.bf16.gmra.mxu1 %v486_v17 }
  0x4d   :  { %301 = vmatmul.bf16.gmra.mxu2 %v490_v18  ;;  %321 = vmatmul.bf16.gmra.mxu3 %v494_v19 }
  0x5c   :  { %266 = vmatmul.bf16.gmra.mxu0 %v483_v20  ;;  %286 = vmatmul.bf16.gmra.mxu1 %v487_v21 }
  0x5d   :  { %306 = vmatmul.bf16.gmra.mxu2 %v491_v22  ;;  %326 = vmatmul.bf16.gmra.mxu3 %v495_v23 }
  0xa9   :  { %v252_v25 = vpop.f32.mrf.mxu0  ;;  %v272_v26 = vpop.f32.mrf.mxu1 }
  0xaa   :  { %v253_v27 = vadd.f32 %v650_v24, %v252_v25  ;;  %v273_v28 = vadd.f32 %v650_v24, %v272_v26 }
  0xac   :  { %332 = vst [vmem:[#allocation7] sm:$0xff] %v253_v27 }
  0xad   :  { %340 = vst [vmem:[#allocation7 + $0x40] sm:$0xff] %v273_v28 }
  0xb0   :  { %v292_v29 = vpop.f32.mrf.mxu2  ;;  %v312_v30 = vpop.f32.mrf.mxu3 }
  0xb1   :  { %v293_v31 = vadd.f32 %v650_v24, %v292_v29  ;;  %v313_v32 = vadd.f32 %v650_v24, %v312_v30  ;;  %v254_v33 = vpop.f32.mrf.mxu0  ;;  %v274_v34 = vpop.f32.mrf.mxu1 }
  0xb2   :  { %v255_v35 = vadd.f32 %v650_v24, %v254_v33  ;;  %v275_v36 = vadd.f32 %v650_v24, %v274_v34 }
  0xb3   :  { %348 = vst [vmem:[#allocation7 + $0x80] sm:$0xff] %v293_v31 }
  0xb4   :  { %356 = vst [vmem:[#allocation7 + $0xc0] sm:$0xff] %v313_v32 }
  0xb5   :  { %333 = vst [vmem:[#allocation7 + $0x8] sm:$0xff] %v255_v35 }
  0xb6   :  { %341 = vst [vmem:[#allocation7 + $0x48] sm:$0xff] %v275_v36 }
  0xb8   :  { %v294_v37 = vpop.f32.mrf.mxu2  ;;  %v314_v38 = vpop.f32.mrf.mxu3 }
  0xb9   :  { %v295_v39 = vadd.f32 %v650_v24, %v294_v37  ;;  %v315_v40 = vadd.f32 %v650_v24, %v314_v38  ;;  %v257_v41 = vpop.f32.mrf.mxu0  ;;  %v277_v42 = vpop.f32.mrf.mxu1 }
  0xba   :  { %v258_v43 = vadd.f32 %v650_v24, %v257_v41  ;;  %v278_v44 = vadd.f32 %v650_v24, %v277_v42 }
  0xbb   :  { %349 = vst [vmem:[#allocation7 + $0x88] sm:$0xff] %v295_v39 }
  0xbc   :  { %357 = vst [vmem:[#allocation7 + $0xc8] sm:$0xff] %v315_v40 }
  0xbd   :  { %334 = vst [vmem:[#allocation7 + $0x10] sm:$0xff] %v258_v43 }
  0xbe   :  { %342 = vst [vmem:[#allocation7 + $0x50] sm:$0xff] %v278_v44 }
  0xc0   :  { %v297_v45 = vpop.f32.mrf.mxu2  ;;  %v317_v46 = vpop.f32.mrf.mxu3 }
  0xc1   :  { %v298_v47 = vadd.f32 %v650_v24, %v297_v45  ;;  %v318_v48 = vadd.f32 %v650_v24, %v317_v46  ;;  %v259_v49 = vpop.f32.mrf.mxu0  ;;  %v279_v50 = vpop.f32.mrf.mxu1 }
  0xc2   :  { %v260_v51 = vadd.f32 %v650_v24, %v259_v49  ;;  %v280_v52 = vadd.f32 %v650_v24, %v279_v50 }
  0xc3   :  { %350 = vst [vmem:[#allocation7 + $0x90] sm:$0xff] %v298_v47 }
  0xc4   :  { %358 = vst [vmem:[#allocation7 + $0xd0] sm:$0xff] %v318_v48 }
  0xc5   :  { %335 = vst [vmem:[#allocation7 + $0x18] sm:$0xff] %v260_v51 }
  0xc6   :  { %343 = vst [vmem:[#allocation7 + $0x58] sm:$0xff] %v280_v52 }
  0xc8   :  { %v299_v53 = vpop.f32.mrf.mxu2  ;;  %v319_v54 = vpop.f32.mrf.mxu3 }
  0xc9   :  { %v300_v55 = vadd.f32 %v650_v24, %v299_v53  ;;  %v320_v56 = vadd.f32 %v650_v24, %v319_v54  ;;  %v262_v57 = vpop.f32.mrf.mxu0  ;;  %v282_v58 = vpop.f32.mrf.mxu1 }
  0xca   :  { %v263_v59 = vadd.f32 %v650_v24, %v262_v57  ;;  %v283_v60 = vadd.f32 %v650_v24, %v282_v58 }
  0xcb   :  { %351 = vst [vmem:[#allocation7 + $0x98] sm:$0xff] %v300_v55 }
  0xcc   :  { %359 = vst [vmem:[#allocation7 + $0xd8] sm:$0xff] %v320_v56 }
  0xcd   :  { %336 = vst [vmem:[#allocation7 + $0x20] sm:$0xff] %v263_v59 }
  0xce   :  { %344 = vst [vmem:[#allocation7 + $0x60] sm:$0xff] %v283_v60 }
  0xd0   :  { %v302_v61 = vpop.f32.mrf.mxu2  ;;  %v322_v62 = vpop.f32.mrf.mxu3 }
  0xd1   :  { %v303_v63 = vadd.f32 %v650_v24, %v302_v61  ;;  %v323_v0 = vadd.f32 %v650_v24, %v322_v62  ;;  %v264_v1 = vpop.f32.mrf.mxu0  ;;  %v284_v2 = vpop.f32.mrf.mxu1 }
  0xd2   :  { %v265_v3 = vadd.f32 %v650_v24, %v264_v1  ;;  %v285_v4 = vadd.f32 %v650_v24, %v284_v2 }
  0xd3   :  { %352 = vst [vmem:[#allocation7 + $0xa0] sm:$0xff] %v303_v63 }
  0xd4   :  { %360 = vst [vmem:[#allocation7 + $0xe0] sm:$0xff] %v323_v0 }
  0xd5   :  { %337 = vst [vmem:[#allocation7 + $0x28] sm:$0xff] %v265_v3 }
  0xd6   :  { %345 = vst [vmem:[#allocation7 + $0x68] sm:$0xff] %v285_v4 }
  0xd8   :  { %v304_v5 = vpop.f32.mrf.mxu2  ;;  %v324_v6 = vpop.f32.mrf.mxu3 }
  0xd9   :  { %v305_v7 = vadd.f32 %v650_v24, %v304_v5  ;;  %v325_v8 = vadd.f32 %v650_v24, %v324_v6  ;;  %v267_v9 = vpop.f32.mrf.mxu0  ;;  %v287_v10 = vpop.f32.mrf.mxu1 }
  0xda   :  { %v268_v11 = vadd.f32 %v650_v24, %v267_v9  ;;  %v288_v12 = vadd.f32 %v650_v24, %v287_v10 }
  0xdb   :  { %353 = vst [vmem:[#allocation7 + $0xa8] sm:$0xff] %v305_v7 }
  0xdc   :  { %361 = vst [vmem:[#allocation7 + $0xe8] sm:$0xff] %v325_v8 }
  0xdd   :  { %338 = vst [vmem:[#allocation7 + $0x30] sm:$0xff] %v268_v11 }
  0xde   :  { %346 = vst [vmem:[#allocation7 + $0x70] sm:$0xff] %v288_v12 }
  0xe0   :  { %v307_v13 = vpop.f32.mrf.mxu2  ;;  %v327_v14 = vpop.f32.mrf.mxu3 }
  0xe1   :  { %v308_v15 = vadd.f32 %v650_v24, %v307_v13  ;;  %v328_v16 = vadd.f32 %v650_v24, %v327_v14  ;;  %v269_v17 = vpop.f32.mrf.mxu0  ;;  %v289_v18 = vpop.f32.mrf.mxu1 }
  0xe2   :  { %v270_v19 = vadd.f32 %v650_v24, %v269_v17  ;;  %v290_v20 = vadd.f32 %v650_v24, %v289_v18 }
  0xe3   :  { %354 = vst [vmem:[#allocation7 + $0xb0] sm:$0xff] %v308_v15 }
  0xe4   :  { %362 = vst [vmem:[#allocation7 + $0xf0] sm:$0xff] %v328_v16 }
  0xe5   :  { %339 = vst [vmem:[#allocation7 + $0x38] sm:$0xff] %v270_v19 }
  0xe6   :  { %347 = vst [vmem:[#allocation7 + $0x78] sm:$0xff] %v290_v20 }
  0xe8   :  { %v309_v21 = vpop.f32.mrf.mxu2  ;;  %v329_v22 = vpop.f32.mrf.mxu3 }
  0xe9   :  { %v310_v23 = vadd.f32 %v650_v24, %v309_v21  ;;  %v330_v25 = vadd.f32 %v650_v24, %v329_v22 }
  0xeb   :  { %355 = vst [vmem:[#allocation7 + $0xb8] sm:$0xff] %v310_v23 }
  0xec   :  { %363 = vst [vmem:[#allocation7 + $0xf8] sm:$0xff] %v330_v25 }
  0xed   :  { %376 = dma.vmem_to_hbm [thread:$0]  %s369_s24, 4096, %s371_s27, [#allocation4], %s619_s28, %s619_s28, %s620_s29  }
  0xee   :  { %612 = dma.done.wait [#allocation4], 4096  }
  0xef   :  { %613 = vsyncadd [#allocation4], 4294963200 }
  0xf0   :  { %381 = vsyncpa [#allocation3], 1 }
  0xf1   :  { %382 = vsyncpa [#allocation6], 1 }
  0xf2   :  { %383 = vsyncpa [#allocation4], 1 }

</bundles_post_ra>
